<compile_context>
chip_gen: v7x
topology: tpu7x:2x2x1
jax: 0.10.0
libtpu: 0.0.40
codegen_flags: <defaults>
</compile_context>

<pallas_src>
import functools

import jax
import jax.numpy as jnp
from jax.experimental import pallas as pl
from jax.experimental.pallas import tpu as pltpu


def _round_up(v, m):
    return ((v + m - 1) // m) * m


def _cdiv(a, b):
    return -(-a // b)


# ---------------------------------------------------------------------------
# Call 1: streamed per-batch sequence sums (HBM-bandwidth bound).
# ---------------------------------------------------------------------------
def cpc_stream_kernel(x_ref, y_ref, xsum_ref, ysum_ref, *,
                      t_x, t_y, seq_block, n_x_tiles, n_y_tiles, n_seq):
    step = pl.program_id(1)

    @pl.when(step == 0)
    def _init():
        xsum_ref[...] = jnp.zeros_like(xsum_ref)
        ysum_ref[...] = jnp.zeros_like(ysum_ref)

    def _tile_sum(ref, t_len):
        tile = ref[...].astype(jnp.float32)
        if t_len % seq_block != 0:
            # Ragged last tile: rows past t_len hold unspecified data -> mask.
            seq_pos = step * seq_block + jax.lax.broadcasted_iota(
                jnp.int32, tile.shape, 1)
            tile = jnp.where(seq_pos < t_len, tile, 0.0)
        return jnp.sum(tile, axis=1)

    def _acc_x():
        xsum_ref[...] += _tile_sum(x_ref, t_x)

    def _acc_y():
        ysum_ref[...] += _tile_sum(y_ref, t_y)

    # Gate only when this input actually has fewer tiles than the grid.
    if n_x_tiles == n_seq:
        _acc_x()
    else:
        pl.when(step < n_x_tiles)(_acc_x)

    if n_y_tiles == n_seq:
        _acc_y()
    else:
        pl.when(step < n_y_tiles)(_acc_y)


# ---------------------------------------------------------------------------
# Call 2: tiny finalize (normalize, NT matmul, logsumexp, mean -> scalar).
# ---------------------------------------------------------------------------
def cpc_finalize_kernel(xsum_ref, ysum_ref, out_ref, *, t_x, t_y, batch):
    xm = xsum_ref[...] * jnp.float32(1.0 / t_x)                 # (B, D)
    ym = ysum_ref[...] * jnp.float32(1.0 / t_y)                 # (B, D)

    # L2-normalize along features (no eps: matches torch's x / x.norm()).
    xn = xm * jax.lax.rsqrt(jnp.sum(xm * xm, axis=-1, keepdims=True))
    yn = ym * jax.lax.rsqrt(jnp.sum(ym * ym, axis=-1, keepdims=True))

    pos = jnp.sum(xn * yn, axis=-1, keepdims=True)              # (B, 1)

    # xn @ yn.T without materializing a transpose: contract dim 1 vs 1.
    logits = jax.lax.dot_general(
        xn, yn, dimension_numbers=(((1,), (1,)), ((), ())),
        preferred_element_type=jnp.float32)                     # (B, B)

    # Full (B, B) logsumexp is fine for small/medium B.
    # TODO(synk): switch to an online column-tiled LSE for B >~ 1024.
    m = jnp.max(logits, axis=-1, keepdims=True)
    neg = m + jnp.log(jnp.sum(jnp.exp(logits - m), axis=-1, keepdims=True))

    out_ref[0, 0] = -jnp.sum(pos - neg) / jnp.float32(batch)


def cpc_pallas(x, y, *, seq_block=None, target_block_bytes=4 * 1024 * 1024):
    """x: (B, Tx, D), y: (B, Ty, D) -> scalar NCE loss (float32)."""
    B, t_x, D = x.shape
    By, t_y, Dy = y.shape
    assert B == By and D == Dy, "batch/feature dims of x and y must match"

    isx = jnp.dtype(x.dtype).itemsize
    isy = jnp.dtype(y.dtype).itemsize

    # Batch split across a "parallel" grid axis (both TCs on v7x stream HBM).
    # Only when each half keeps an (8, .) sublane-aligned layout.
    nb = 2 if (B >= 16 and B % 16 == 0) else 1
    Bb = B // nb

    # dtype-dependent sublane alignment of the sequence (2nd-to-last) block dim.
    align = max(max(8, 32 // isx), max(8, 32 // isy))

    max_t = max(t_x, t_y)
    if seq_block is None:
        # Largest aligned tile whose per-input block stays under the byte
        # budget; never floors below `align`, never exceeds the data itself.
        per_seq_row = Bb * D * max(isx, isy)
        tt = (target_block_bytes // max(1, per_seq_row)) // align * align
        seq_block = int(min(_round_up(max_t, align), max(align, tt)))
        # TODO(synk): if B*D is so large that even the minimum aligned tile
        # blows the VMEM budget, also tile D (partial sums per D-slab).
    seq_block = max(align, _round_up(int(seq_block), align))
    seq_block = min(seq_block, _round_up(max_t, align))

    n_x = _cdiv(t_x, seq_block)
    n_y = _cdiv(t_y, seq_block)
    n_seq = max(n_x, n_y)

    # Clamp the shorter input's sequence block index so the revisited block
    # is not re-DMA'd once its tiles are exhausted.
    if n_x == n_seq:
        x_map = lambda b, t: (b, t, 0)
    else:
        x_last = n_x - 1
        x_map = lambda b, t: (b, jnp.minimum(t, x_last), 0)
    if n_y == n_seq:
        y_map = lambda b, t: (b, t, 0)
    else:
        y_last = n_y - 1
        y_map = lambda b, t: (b, jnp.minimum(t, y_last), 0)

    stream_kernel = functools.partial(
        cpc_stream_kernel, t_x=t_x, t_y=t_y, seq_block=seq_block,
        n_x_tiles=n_x, n_y_tiles=n_y, n_seq=n_seq)

    # VMEM limit from actual usage: 2 double-buffered inputs + 2 resident
    # (double-buffered across batch blocks) accumulators, 2x headroom,
    # kept well inside v7x's 64 MiB physical VMEM for the default sizing.
    x_blk = Bb * seq_block * D * isx
    y_blk = Bb * seq_block * D * isy
    o_blk = Bb * D * 4
    stream_need = 2 * (x_blk + y_blk) + 2 * 2 * o_blk
    stream_vmem = int(max(16 << 20, min(48 << 20, 2 * stream_need)))
    stream_vmem = int(max(stream_vmem, stream_need + (4 << 20)))

    stream_cost = pl.CostEstimate(
        flops=B * (t_x + t_y) * D,
        transcendentals=0,
        bytes_accessed=B * t_x * D * isx + B * t_y * D * isy + 2 * B * D * 4,
    )

    xsum, ysum = pl.pallas_call(
        stream_kernel,
        out_shape=(jax.ShapeDtypeStruct((B, D), jnp.float32),
                   jax.ShapeDtypeStruct((B, D), jnp.float32)),
        grid=(nb, n_seq),
        in_specs=[
            pl.BlockSpec((Bb, seq_block, D), x_map),
            pl.BlockSpec((Bb, seq_block, D), y_map),
        ],
        out_specs=[
            pl.BlockSpec((Bb, D), lambda b, t: (b, 0)),
            pl.BlockSpec((Bb, D), lambda b, t: (b, 0)),
        ],
        compiler_params=pltpu.CompilerParams(
            dimension_semantics=("parallel", "arbitrary"),
            vmem_limit_bytes=stream_vmem,
        ),
        cost_estimate=stream_cost,
    )(x, y)

    # Finalize call: O(B*D + B^2) work, negligible next to the streaming.
    fin_need = 8 * B * D * 4 + 4 * B * B * 4
    fin_vmem = int(max(16 << 20, min(48 << 20, 4 * fin_need)))
    fin_cost = pl.CostEstimate(
        flops=2 * B * B * D + 10 * B * D + 4 * B * B,
        transcendentals=B * B + 3 * B,
        bytes_accessed=2 * B * D * 4 + 4,
    )

    out = pl.pallas_call(
        functools.partial(cpc_finalize_kernel, t_x=t_x, t_y=t_y, batch=B),
        out_shape=jax.ShapeDtypeStruct((1, 1), jnp.float32),
        grid=(1,),
        in_specs=[
            pl.BlockSpec((B, D), lambda i: (0, 0)),
            pl.BlockSpec((B, D), lambda i: (0, 0)),
        ],
        out_specs=pl.BlockSpec(memory_space=pltpu.MemorySpace.SMEM),
        compiler_params=pltpu.CompilerParams(
            dimension_semantics=("arbitrary",),
            vmem_limit_bytes=fin_vmem,
        ),
        cost_estimate=fin_cost,
    )(xsum, ysum)
    return out[0, 0]


def cpc_reference(x, y):
    """Pure-JAX reference mirroring the PyTorch forward exactly."""
    xm = jnp.mean(x, axis=-2)
    ym = jnp.mean(y, axis=-2)
    xn = xm / jnp.linalg.norm(xm, axis=1, keepdims=True)
    yn = ym / jnp.linalg.norm(ym, axis=1, keepdims=True)
    pos = jnp.sum(xn * yn, axis=-1)
    neg = jax.scipy.special.logsumexp(xn @ yn.T, axis=-1)
    return -jnp.mean(pos - neg)


if __name__ == "__main__":
    key = jax.random.PRNGKey(0)
    kx, ky = jax.random.split(key)

    # Test 1: f32, tile-UNaligned sequence lengths (exercises in-kernel tail
    # masking and the decoupled / clamped x-vs-y tile streaming), small
    # seq_block to force a multi-step grid.  batch=8, seq=60/44, hidden=128.
    B, Tx, Ty, D = 8, 60, 44, 128
    x = jax.random.normal(kx, (B, Tx, D), dtype=jnp.float32)
    y = jax.random.normal(ky, (B, Ty, D), dtype=jnp.float32)

    nce = jax.block_until_ready(cpc_pallas(x, y, seq_block=16))
    ref = jax.block_until_ready(cpc_reference(x, y))
    assert jnp.isfinite(nce), "kernel produced non-finite value"
    assert jnp.allclose(nce, ref, atol=1e-4, rtol=1e-4), (nce, ref)

    # Test 2: bf16 inputs (half the streamed HBM bytes, f32 accumulation),
    # batch=16 exercises the batch-parallel split (megacore path on v7x),
    # seq_block auto-sized by bytes.
    B2, T2, D2 = 16, 64, 128
    k1, k2 = jax.random.split(ky)
    x2 = jax.random.normal(k1, (B2, T2, D2), dtype=jnp.float32)
    y2 = jax.random.normal(k2, (B2, T2, D2), dtype=jnp.float32)
    xb = x2.astype(jnp.bfloat16)
    yb = y2.astype(jnp.bfloat16)

    nce_bf16 = jax.block_until_ready(cpc_pallas(xb, yb))
    ref_bf16 = jax.block_until_ready(
        cpc_reference(xb.astype(jnp.float32), yb.astype(jnp.float32)))
    assert jnp.isfinite(nce_bf16), "bf16 kernel produced non-finite value"
    assert jnp.allclose(nce_bf16, ref_bf16, atol=2e-2, rtol=2e-2), (
        nce_bf16, ref_bf16)

    print("KERNEL_OK")
</pallas_src>

<mosaic_0001>
module attributes {stable_mosaic.version = 11 : i64} {
  func.func @cpc_stream_kernel(%arg0: i32, %arg1: i32, %arg2: memref<8x16x128xf32, #tpu.memory_space<vmem>>, %arg3: memref<8x16x128xf32, #tpu.memory_space<vmem>>, %arg4: memref<8x128xf32, #tpu.memory_space<vmem>>, %arg5: memref<8x128xf32, #tpu.memory_space<vmem>>) attributes {dimension_semantics = [#tpu.dimension_semantics<parallel>, #tpu.dimension_semantics<arbitrary>], iteration_bounds = array<i64: 1, 4>, scalar_prefetch = 0 : i64, scratch_operands = 0 : i64, tpu.core_type = #tpu.core_type<tc>, window_params = [{transform_indices = @transform_0, window_bounds = array<i64: 8, 16, 128>}, {transform_indices = @transform_1, window_bounds = array<i64: 8, 16, 128>}, {transform_indices = @transform_2, window_bounds = array<i64: 8, 128>}, {transform_indices = @transform_3, window_bounds = array<i64: 8, 128>}]} {
    %c0_i32 = arith.constant 0 : i32
    %0 = arith.cmpi eq, %arg1, %c0_i32 : i32
    %1 = arith.extui %0 : i1 to i32
    %c0_i32_0 = arith.constant 0 : i32
    %2 = arith.cmpi ne, %1, %c0_i32_0 : i32
    scf.if %2 {
      %cst_9 = arith.constant 0.000000e+00 : f32
      %19 = vector.broadcast %cst_9 : f32 to vector<8x128xf32>
      %c0_10 = arith.constant 0 : index
      %c0_11 = arith.constant 0 : index
      %20 = vector.load %arg4[%c0_10, %c0_11] : memref<8x128xf32, #tpu.memory_space<vmem>>, vector<8x128xf32>
      tpu.vector_store %arg4[%c0_10, %c0_11], %19 {strides = array<i32>} : memref<8x128xf32, #tpu.memory_space<vmem>>, vector<8x128xf32>,
      %cst_12 = arith.constant 0.000000e+00 : f32
      %21 = vector.broadcast %cst_12 : f32 to vector<8x128xf32>
      %c0_13 = arith.constant 0 : index
      %c0_14 = arith.constant 0 : index
      %22 = vector.load %arg5[%c0_13, %c0_14] : memref<8x128xf32, #tpu.memory_space<vmem>>, vector<8x128xf32>
      tpu.vector_store %arg5[%c0_13, %c0_14], %21 {strides = array<i32>} : memref<8x128xf32, #tpu.memory_space<vmem>>, vector<8x128xf32>,
    } else {
    }
    %c0 = arith.constant 0 : index
    %c0_1 = arith.constant 0 : index
    %3 = vector.load %arg4[%c0, %c0_1] : memref<8x128xf32, #tpu.memory_space<vmem>>, vector<8x128xf32>
    %c0_2 = arith.constant 0 : index
    %c0_3 = arith.constant 0 : index
    %c0_4 = arith.constant 0 : index
    %4 = vector.load %arg2[%c0_2, %c0_3, %c0_4] : memref<8x16x128xf32, #tpu.memory_space<vmem>>, vector<8x16x128xf32>
    %c16_i32 = arith.constant 16 : i32
    %5 = arith.muli %arg1, %c16_i32 : i32
    %6 = tpu.iota {dimensions = array<i32: 1>} : vector<8x16x128xi32>
    %7 = vector.broadcast %5 : i32 to vector<8x16x128xi32>
    %8 = arith.addi %7, %6 : vector<8x16x128xi32>
    %c60_i32 = arith.constant 60 : i32
    %9 = vector.broadcast %c60_i32 : i32 to vector<8x16x128xi32>
    %10 = arith.cmpi slt, %8, %9 : vector<8x16x128xi32>
    %cst = arith.constant 0.000000e+00 : f32
    %11 = vector.broadcast %cst : f32 to vector<8x16x128xf32>
    %12 = arith.select %10, %4, %11 : vector<8x16x128xi1>, vector<8x16x128xf32>
    %cst_5 = arith.constant dense<0.000000e+00> : vector<8x128xf32>
    %13 = vector.multi_reduction <add>, %12, %cst_5 [1] : vector<8x16x128xf32> to vector<8x128xf32>
    %14 = arith.addf %3, %13 : vector<8x128xf32>
    %c0_6 = arith.constant 0 : index
    %c0_7 = arith.constant 0 : index
    %15 = vector.load %arg4[%c0_6, %c0_7] : memref<8x128xf32, #tpu.memory_space<vmem>>, vector<8x128xf32>
    tpu.vector_store %arg4[%c0_6, %c0_7], %14 {strides = array<i32>} : memref<8x128xf32, #tpu.memory_space<vmem>>, vector<8x128xf32>,
    %c3_i32 = arith.constant 3 : i32
    %16 = arith.cmpi slt, %arg1, %c3_i32 : i32
    %17 = arith.extui %16 : i1 to i32
    %c0_i32_8 = arith.constant 0 : i32
    %18 = arith.cmpi ne, %17, %c0_i32_8 : i32
    scf.if %18 {
      %c0_9 = arith.constant 0 : index
      %c0_10 = arith.constant 0 : index
      %19 = vector.load %arg5[%c0_9, %c0_10] : memref<8x128xf32, #tpu.memory_space<vmem>>, vector<8x128xf32>
      %c0_11 = arith.constant 0 : index
      %c0_12 = arith.constant 0 : index
      %c0_13 = arith.constant 0 : index
      %20 = vector.load %arg3[%c0_11, %c0_12, %c0_13] : memref<8x16x128xf32, #tpu.memory_space<vmem>>, vector<8x16x128xf32>
      %c16_i32_14 = arith.constant 16 : i32
      %21 = arith.muli %arg1, %c16_i32_14 : i32
      %22 = tpu.iota {dimensions = array<i32: 1>} : vector<8x16x128xi32>
      %23 = vector.broadcast %21 : i32 to vector<8x16x128xi32>
      %24 = arith.addi %23, %22 : vector<8x16x128xi32>
      %c44_i32 = arith.constant 44 : i32
      %25 = vector.broadcast %c44_i32 : i32 to vector<8x16x128xi32>
      %26 = arith.cmpi slt, %24, %25 : vector<8x16x128xi32>
      %cst_15 = arith.constant 0.000000e+00 : f32
      %27 = vector.broadcast %cst_15 : f32 to vector<8x16x128xf32>
      %28 = arith.select %26, %20, %27 : vector<8x16x128xi1>, vector<8x16x128xf32>
      %cst_16 = arith.constant dense<0.000000e+00> : vector<8x128xf32>
      %29 = vector.multi_reduction <add>, %28, %cst_16 [1] : vector<8x16x128xf32> to vector<8x128xf32>
      %30 = arith.addf %19, %29 : vector<8x128xf32>
      %c0_17 = arith.constant 0 : index
      %c0_18 = arith.constant 0 : index
      %31 = vector.load %arg5[%c0_17, %c0_18] : memref<8x128xf32, #tpu.memory_space<vmem>>, vector<8x128xf32>
      tpu.vector_store %arg5[%c0_17, %c0_18], %30 {strides = array<i32>} : memref<8x128xf32, #tpu.memory_space<vmem>>, vector<8x128xf32>,
    } else {
    }
    return
  }
  func.func @transform_0(%arg0: i32, %arg1: i32) -> (i32, i32, i32) {
    %c0_i32 = arith.constant 0 : i32
    %c0_i32_0 = arith.constant 0 : i32
    return %arg0, %arg1, %c0_i32 : i32, i32, i32
  }
  func.func @transform_1(%arg0: i32, %arg1: i32) -> (i32, i32, i32) {
    %c2_i32 = arith.constant 2 : i32
    %0 = arith.minsi %arg1, %c2_i32 : i32
    %c0_i32 = arith.constant 0 : i32
    %c0_i32_0 = arith.constant 0 : i32
    return %arg0, %0, %c0_i32 : i32, i32, i32
  }
  func.func @transform_2(%arg0: i32, %arg1: i32) -> (i32, i32) {
    %c0_i32 = arith.constant 0 : i32
    %c0_i32_0 = arith.constant 0 : i32
    return %arg0, %c0_i32 : i32, i32
  }
  func.func @transform_3(%arg0: i32, %arg1: i32) -> (i32, i32) {
    %c0_i32 = arith.constant 0 : i32
    %c0_i32_0 = arith.constant 0 : i32
    return %arg0, %c0_i32 : i32, i32
  }
}

</mosaic_0001>

<bundles_post_ra>
// kernel: tpu_custom_call.1
= control target key start
LH: loop header
LB: loop body
LE: loop exit
PB: predicated region body
PF: predicated region fallthrough
CT: control target
= control target key end

     0   :  { %9 = vsyncpa [#allocation5], 0  ;;  %s1315_s0 = inlined_call_operand.vmem [shape: f32[8,60,128], index: 0, kind: input, shape index: {}]   ;;  %s1316_s1 = inlined_call_operand.vmem [shape: f32[8,44,128], index: 1, kind: input, shape index: {}]   ;;  %s1317_s2 = inlined_call_operand.hbm [shape: f32[8,128], index: 2, kind: output, shape index: {0}]   ;;  %s1318_s3 = inlined_call_operand.hbm [shape: f32[8,128], index: 3, kind: output, shape index: {1}]  }
   0x1   :  { %10 = vsyncpa [#allocation7], 0  ;;  %s1000_s12 = smov 0   ;;  %s1002_s13 = smov 0  }
   0x2   :  { %s1004_s14 = smov 0   ;;  %s1006_s15 = smov 0  }
   0x3   :  { %s1008_s16 = smov 0   ;;  %s1010_s17 = smov 0  }
   0x4   :  { %s1012_s18 = smov 0  }
   0x5 LB: > { %s767_s19 = sadd.s32 4294967295, %s975_s18   ;;  %s25_s20 = sadd.s32 1, %s971_s17  ;;  %s975_s18 = sphi %s1012_s18, %s16_s18   ;;  %s971_s17 = sphi %s1010_s17, %s1327_s17   ;;  %s967_s16 = sphi %s1008_s16, %s1326_s16   ;;  %s963_s15 = sphi %s1006_s15, %s1325_s15   ;;  %s959_s14 = sphi %s1004_s14, %s1324_s14   ;;  %s955_s13 = sphi %s1002_s13, %s1323_s13   ;;  %s951_s12 = sphi %s1000_s12, %s1322_s12  }
   0x6   : > { %p26_p0 = scmp.ge.s32.totalorder %s25_s20, 4  ;;  %s37_s21 = sadd.s32 1, %s963_s15 }
   0x7   : > { %p44_p1 = scmp.ne.s32.totalorder %s963_s15, %s959_s14  ;;  %p45_p2 = scmp.eq.s32.totalorder %s975_s18, 0 }
   0x8   : > { %s1329_s20 = smov (%p26_p0, %s25_s20), 0  ;;  %p60_p4 = scmp.lt.s32.totalorder %s971_s17, 2 }
   0x9   : > { %p1045_p3 = por %p45_p2, %p44_p1  ;;  %s33_s23 = ssub.s32 %s971_s17, %s1329_s20 }
   0xa   : > { %p62_p5 = scmp.lt.s32.totalorder %s1329_s20, 2  ;;  %p35_p6 = scmp.eq.s32.totalorder %s33_s23, 0 }
   0xb   : > { %s1054_s24 = scalar_select %p60_p4, %s971_s17, 2 }
   0xc   : > { %s1057_s25 = scalar_select %p35_p6, %s963_s15, %s37_s21  }
   0xd   : > { %s63_s26 = scalar_select %p62_p5, %s1329_s20, 2 }
   0xe   : > { %p76_p7 = scmp.ne.s32.totalorder %s955_s13, %s951_s12  ;;  %s69_s28 = sadd.s32 1, %s955_s13 }
   0xf   : > { %s65_s27 = ssub.s32 %s1054_s24, %s63_s26  ;;  %p769_p10 = scmp.ge.s32.totalorder %s975_s18, 4 }
  0x10   : > { %p67_p8 = scmp.eq.s32.totalorder %s65_s27, 0  ;;  %p1066_p9 = por %p76_p7, %p45_p2 }
  0x11   : > { %154 = sbr.rel (%p769_p10) target bundleno = 48 (0x30), region = 16 }
  0x12   : > { %s1071_s30 = scalar_select %p67_p8, %s955_s13, %s69_s28  }
  0x18   : > { %157 = sbr.rel (!%p1045_p3) target bundleno = 36 (0x24), region = 20  ;;  %s159_s4 = sand.u32 (%p1045_p3), 1, %s963_s15  }
  0x19   : > { %s788_s5 = sshll.u32 (%p1045_p3), %s971_s17, 4  ;;  %s770_s6 = sshll.u32 (%p1045_p3), %s159_s4, 7 }
  0x1a   : > { %s1081_s9 = scalar_lea.vmem (%p1045_p3), %s1315_s0, %s788_s5  ;;  %s161_s10 = scalar_lea.vmem (%p1045_p3), [#allocation2], %s770_s6 }
  0x1b   : > { %v225_v0 = vld [vmem:[%s1081_s9] sm:$0xff] (%p1045_p3)  ;;  %v227_v1 = vld [vmem:[%s1081_s9 + $0x8] sm:$0xff] (%p1045_p3) }
  0x1c   : > { %v229_v2 = vld [vmem:[%s1081_s9 + $0x40] sm:$0xff] (%p1045_p3)  ;;  %226 = vst [vmem:[%s161_s10] sm:$0xff] (%p1045_p3), %v225_v0  ;;  %228 = vst [vmem:[%s161_s10 + $0x8] sm:$0xff] (%p1045_p3), %v227_v1  ;;  %v231_v3 = vld [vmem:[%s1081_s9 + $0x48] sm:$0xff] (%p1045_p3) }
  0x1d   : > { %230 = vst [vmem:[%s161_s10 + $0x10] sm:$0xff] (%p1045_p3), %v229_v2  ;;  %v233_v4 = vld [vmem:[%s1081_s9 + $0x80] sm:$0xff] (%p1045_p3)  ;;  %v235_v5 = vld [vmem:[%s1081_s9 + $0x88] sm:$0xff] (%p1045_p3)  ;;  %232 = vst [vmem:[%s161_s10 + $0x18] sm:$0xff] (%p1045_p3), %v231_v3 }
  0x1e   : > { %234 = vst [vmem:[%s161_s10 + $0x20] sm:$0xff] (%p1045_p3), %v233_v4  ;;  %236 = vst [vmem:[%s161_s10 + $0x28] sm:$0xff] (%p1045_p3), %v235_v5  ;;  %v237_v6 = vld [vmem:[%s1081_s9 + $0xc0] sm:$0xff] (%p1045_p3)  ;;  %v239_v7 = vld [vmem:[%s1081_s9 + $0xc8] sm:$0xff] (%p1045_p3) }
  0x1f   : > { %v241_v8 = vld [vmem:[%s1081_s9 + $0x100] sm:$0xff]  ;;  %238 = vst [vmem:[%s161_s10 + $0x30] sm:$0xff] %v237_v6  ;;  %240 = vst [vmem:[%s161_s10 + $0x38] sm:$0xff] %v239_v7  ;;  %v243_v9 = vld [vmem:[%s1081_s9 + $0x108] sm:$0xff] }
  0x20   : > { %242 = vst [vmem:[%s161_s10 + $0x40] sm:$0xff] %v241_v8  ;;  %v245_v10 = vld [vmem:[%s1081_s9 + $0x140] sm:$0xff]  ;;  %v247_v11 = vld [vmem:[%s1081_s9 + $0x148] sm:$0xff]  ;;  %244 = vst [vmem:[%s161_s10 + $0x48] sm:$0xff] %v243_v9 }
  0x21   : > { %246 = vst [vmem:[%s161_s10 + $0x50] sm:$0xff] %v245_v10  ;;  %248 = vst [vmem:[%s161_s10 + $0x58] sm:$0xff] %v247_v11  ;;  %v249_v12 = vld [vmem:[%s1081_s9 + $0x180] sm:$0xff]  ;;  %v251_v13 = vld [vmem:[%s1081_s9 + $0x188] sm:$0xff] }
  0x22   : > { %v253_v14 = vld [vmem:[%s1081_s9 + $0x1c0] sm:$0xff]  ;;  %250 = vst [vmem:[%s161_s10 + $0x60] sm:$0xff] %v249_v12  ;;  %252 = vst [vmem:[%s161_s10 + $0x68] sm:$0xff] %v251_v13  ;;  %v255_v15 = vld [vmem:[%s1081_s9 + $0x1c8] sm:$0xff] }
  0x23   : > { %254 = vst [vmem:[%s161_s10 + $0x70] sm:$0xff] %v253_v14  ;;  %256 = vst [vmem:[%s161_s10 + $0x78] sm:$0xff] %v255_v15 }
  0x24 PF: > { %262 = sbr.rel (!%p1066_p9) target bundleno = 48 (0x30), region = 58  ;;  %s264_s11 = sand.u32 (%p1066_p9), 1, %s955_s13  }
  0x25   : > { %s789_s21 = sshll.u32 (%p1066_p9), %s1054_s24, 4  ;;  %s773_s22 = sshll.u32 (%p1066_p9), %s264_s11, 7 }
  0x26   : > { %s1106_s27 = scalar_lea.vmem (%p1066_p9), %s1316_s1, %s789_s21  ;;  %s266_s28 = scalar_lea.vmem (%p1066_p9), [#allocation3], %s773_s22 }
  0x27   : > { %v332_v16 = vld [vmem:[%s1106_s27] sm:$0xff] (%p1066_p9)  ;;  %v334_v17 = vld [vmem:[%s1106_s27 + $0x8] sm:$0xff] (%p1066_p9)  ;;  %v336_v18 = vld [vmem:[%s1106_s27 + $0x30] sm:$0xff] (%p1066_p9) }
  0x28   : > { %333 = vst [vmem:[%s266_s28] sm:$0xff] (%p1066_p9), %v332_v16  ;;  %335 = vst [vmem:[%s266_s28 + $0x8] sm:$0xff] (%p1066_p9), %v334_v17  ;;  %v338_v19 = vld [vmem:[%s1106_s27 + $0x38] sm:$0xff] (%p1066_p9)  ;;  %v340_v20 = vld [vmem:[%s1106_s27 + $0x60] sm:$0xff] (%p1066_p9) }
  0x29   : > { %337 = vst [vmem:[%s266_s28 + $0x10] sm:$0xff] (%p1066_p9), %v336_v18  ;;  %v342_v21 = vld [vmem:[%s1106_s27 + $0x68] sm:$0xff] (%p1066_p9)  ;;  %339 = vst [vmem:[%s266_s28 + $0x18] sm:$0xff] (%p1066_p9), %v338_v19  ;;  %v344_v22 = vld [vmem:[%s1106_s27 + $0x90] sm:$0xff] (%p1066_p9) }
  0x2a   : > { %341 = vst [vmem:[%s266_s28 + $0x20] sm:$0xff] (%p1066_p9), %v340_v20  ;;  %343 = vst [vmem:[%s266_s28 + $0x28] sm:$0xff] (%p1066_p9), %v342_v21  ;;  %v346_v23 = vld [vmem:[%s1106_s27 + $0x98] sm:$0xff] (%p1066_p9)  ;;  %v348_v24 = vld [vmem:[%s1106_s27 + $0xc0] sm:$0xff] (%p1066_p9) }
  0x2b   : > { %345 = vst [vmem:[%s266_s28 + $0x30] sm:$0xff] %v344_v22  ;;  %347 = vst [vmem:[%s266_s28 + $0x38] sm:$0xff] %v346_v23  ;;  %v350_v25 = vld [vmem:[%s1106_s27 + $0xc8] sm:$0xff]  ;;  %v352_v26 = vld [vmem:[%s1106_s27 + $0xf0] sm:$0xff] }
  0x2c   : > { %349 = vst [vmem:[%s266_s28 + $0x40] sm:$0xff] %v348_v24  ;;  %v354_v27 = vld [vmem:[%s1106_s27 + $0xf8] sm:$0xff]  ;;  %351 = vst [vmem:[%s266_s28 + $0x48] sm:$0xff] %v350_v25  ;;  %v356_v28 = vld [vmem:[%s1106_s27 + $0x120] sm:$0xff] }
  0x2d   : > { %353 = vst [vmem:[%s266_s28 + $0x50] sm:$0xff] %v352_v26  ;;  %355 = vst [vmem:[%s266_s28 + $0x58] sm:$0xff] %v354_v27  ;;  %v358_v29 = vld [vmem:[%s1106_s27 + $0x128] sm:$0xff]  ;;  %v360_v30 = vld [vmem:[%s1106_s27 + $0x150] sm:$0xff] }
  0x2e   : > { %357 = vst [vmem:[%s266_s28 + $0x60] sm:$0xff] %v356_v28  ;;  %359 = vst [vmem:[%s266_s28 + $0x68] sm:$0xff] %v358_v29  ;;  %v362_v31 = vld [vmem:[%s1106_s27 + $0x158] sm:$0xff] }
  0x2f   : > { %361 = vst [vmem:[%s266_s28 + $0x70] sm:$0xff] %v360_v30  ;;  %363 = vst [vmem:[%s266_s28 + $0x78] sm:$0xff] %v362_v31 }
  0x30 PF: > { %p776_p11 = scmp.ge.s32.totalorder %s975_s18, 1  ;;  %p368_p12 = scmp.lt.s32.totalorder %s975_s18, 5 }
  0x32   : > { %p369_p13 = pnand %p776_p11, %p368_p12 }
  0x33   : > { %s375_s24 = sand.u32 (!%p369_p13), 1, %s959_s14   ;;  %s382_s29 = sand.u32 (!%p369_p13), 1, %s951_s12  }
  0x34   : > { %372 = sbr.rel (%p369_p13) target bundleno = 169 (0xa9), region = 96  ;;  %s777_s4 = sshll.u32 (!%p369_p13), %s375_s24, 7 }
  0x35   : > { %s778_s5 = sshll.u32 (!%p369_p13), %s382_s29, 7  ;;  %s1128_s6 = scalar_lea.vmem (!%p369_p13), [#allocation2], %s777_s4 }
  0x36   : > { %s1130_s7 = scalar_lea.vmem (!%p369_p13), [#allocation3], %s778_s5  ;;  %p779_p0 = scmp.ne.s32.totalorder (!%p369_p13), %s967_s16, 0 }
  0x3b   : > { %413 = sbr.rel (%p779_p0) target bundleno = 66 (0x42), region = 108  ;;  %v977_v32 = vmov (!%p779_p0), 0.0  }
  0x3c   : > { %414 = vst [vmem:[#allocation4] sm:$0xff] (!%p779_p0), %v977_v32  ;;  %415 = vst [vmem:[#allocation6] sm:$0xff] (!%p779_p0), %v977_v32 }
  0x42 PF: > { %s780_s12 = sshll.u32 %s967_s16, 4  ;;  %v434_v33 = vlaneseq  ;;  %v417_v36 = vld [vmem:[%s1128_s6] sm:$0xff]  ;;  %v419_v37 = vld [vmem:[%s1128_s6 + $0x10] sm:$0xff]  ;;  %v418_v38 = vld [vmem:[%s1128_s6 + $0x8] sm:$0xff]  ;;  %vm522_vm2 = vcmask 1041409   ;;  %vm524_vm3 = vcmask 1042434  }
  0x43   : > { %v437_v34 = vstv %s780_s12  ;;  %v420_v39 = vld [vmem:[%s1128_s6 + $0x18] sm:$0xff]  ;;  %v421_v40 = vld [vmem:[%s1128_s6 + $0x20] sm:$0xff]  ;;  %v422_v41 = vld [vmem:[%s1128_s6 + $0x28] sm:$0xff]  ;;  %vm526_vm4 = vcmask 1043459   ;;  %vm528_vm5 = vcmask 1044484   ;;  %vm530_vm6 = vcmask 1045509  }
  0x44   : > { %v435_v35 = vshrl.u32 %v434_v33, 7  ;;  %v423_v42 = vld [vmem:[%s1128_s6 + $0x30] sm:$0xff]  ;;  %v425_v45 = vld [vmem:[%s1128_s6 + $0x40] sm:$0xff]  ;;  %v424_v48 = vld [vmem:[%s1128_s6 + $0x38] sm:$0xff]  ;;  %vm532_vm7 = vcmask 1046534   ;;  %vm534_vm8 = vcmask 1047559  }
  0x45   : > { %v427_v46 = vld [vmem:[%s1128_s6 + $0x50] sm:$0xff]  ;;  %v429_v47 = vld [vmem:[%s1128_s6 + $0x60] sm:$0xff]  ;;  %v426_v49 = vld [vmem:[%s1128_s6 + $0x48] sm:$0xff]  ;;  %p781_p1 = scmp.ge.s32.totalorder %s967_s16, 3 }
  0x46   : > { %v436_v43 = vadd.s32 8, %v435_v35  ;;  %v1141_v44 = vadd.s32 %v437_v34, %v435_v35  ;;  %v428_v50 = vld [vmem:[%s1128_s6 + $0x58] sm:$0xff]  ;;  %v430_v52 = vld [vmem:[%s1128_s6 + $0x68] sm:$0xff]  ;;  %v431_v53 = vld [vmem:[%s1128_s6 + $0x70] sm:$0xff] }
  0x47   : > { %v432_v58 = vld [vmem:[%s1128_s6 + $0x78] sm:$0xff] }
  0x48   : > { %v1149_v51 = vadd.s32 %v437_v34, %v436_v43  ;;  %vm440_vm0 = vcmp.lt.s32.totalorder %v1141_v44, 60  ;;  %vm560_vm9 = vcmp.lt.s32.totalorder (!%p781_p1), %v1141_v44, 44 }
  0x49   : > { %v442_v54 = vsel %vm440_vm0, %v417_v36, 0.0  ;;  %v444_v55 = vsel %vm440_vm0, %v419_v37, 0.0  ;;  %v446_v56 = vsel %vm440_vm0, %v421_v40, 0.0  ;;  %v448_v57 = vsel %vm440_vm0, %v423_v42, 0.0 }
  0x4a   : > { %vm441_vm1 = vcmp.lt.s32.totalorder %v1149_v51, 60  ;;  %v450_v59 = vsel %vm440_vm0, %v425_v45, 0.0  ;;  %v452_v60 = vsel %vm440_vm0, %v427_v46, 0.0  ;;  %v454_v61 = vsel %vm440_vm0, %v429_v47, 0.0 }
  0x4b   : > { %v443_v62 = vsel %vm441_vm1, %v418_v38, 0.0  ;;  %v445_v63 = vsel %vm441_vm1, %v420_v39, 0.0  ;;  %v447_v0 = vsel %vm441_vm1, %v422_v41, 0.0  ;;  %v449_v1 = vsel %vm441_vm1, %v424_v48, 0.0 }
  0x4c   : > { %v451_v2 = vsel %vm441_vm1, %v426_v49, 0.0  ;;  %v453_v3 = vsel %vm441_vm1, %v428_v50, 0.0  ;;  %v455_v4 = vsel %vm441_vm1, %v430_v52, 0.0  ;;  %v456_v5 = vsel %vm440_vm0, %v431_v53, 0.0 }
  0x4d   : > { %v457_v6 = vsel %vm441_vm1, %v432_v58, 0.0  ;;  %v458_v7 = vadd.f32 %v443_v62, %v442_v54  ;;  %v465_v8 = vadd.f32 %v445_v63, %v444_v55  ;;  %v472_v9 = vadd.f32 %v447_v0, %v446_v56 }
  0x4e   : > { %v479_v10 = vadd.f32 %v449_v1, %v448_v57  ;;  %v486_v11 = vadd.f32 %v451_v2, %v450_v59  ;;  %v493_v12 = vadd.f32 %v453_v3, %v452_v60  ;;  %v500_v13 = vadd.f32 %v455_v4, %v454_v61 }
  0x4f   : > { %v459_v14 = vrot.slane %v458_v7, 4  ;;  %v466_v15 = vrot.slane %v465_v8, 4  ;;  %v473_v16 = vrot.slane %v472_v9, 4  ;;  %v507_v17 = vadd.f32 %v457_v6, %v456_v5  ;;  %v416_v5 = vld [vmem:[#allocation4] sm:$0xff] }
  0x50   : > { %v480_v18 = vrot.slane %v479_v10, 4  ;;  %v487_v19 = vrot.slane %v486_v11, 4  ;;  %v494_v20 = vrot.slane %v493_v12, 4  ;;  %v501_v21 = vrot.slane %v500_v13, 4 }
  0x51   : > { %v460_v22 = vadd.f32 %v459_v14, %v458_v7  ;;  %v467_v23 = vadd.f32 %v466_v15, %v465_v8  ;;  %v474_v24 = vadd.f32 %v473_v16, %v472_v9  ;;  %v508_v25 = vrot.slane %v507_v17, 4  ;;  %v548_v14 = vld [vmem:[%s1130_s7 + $0x20] sm:$0xff] (!%p781_p1) }
  0x52   : > { %v481_v26 = vadd.f32 %v480_v18, %v479_v10  ;;  %v488_v27 = vadd.f32 %v487_v19, %v486_v11  ;;  %v495_v28 = vadd.f32 %v494_v20, %v493_v12  ;;  %v502_v29 = vadd.f32 %v501_v21, %v500_v13  ;;  %v544_v10 = vld [vmem:[%s1130_s7] sm:$0xff] (!%p781_p1)  ;;  %v545_v11 = vld [vmem:[%s1130_s7 + $0x8] sm:$0xff] (!%p781_p1)  ;;  %v546_v12 = vld [vmem:[%s1130_s7 + $0x10] sm:$0xff] (!%p781_p1) }
  0x53   : > { %v461_v30 = vrot.slane %v460_v22, 2  ;;  %v468_v31 = vrot.slane %v467_v23, 2  ;;  %v475_v32 = vrot.slane %v474_v24, 2  ;;  %v509_v33 = vadd.f32 %v508_v25, %v507_v17  ;;  %v547_v13 = vld [vmem:[%s1130_s7 + $0x18] sm:$0xff] (!%p781_p1)  ;;  %v549_v17 = vld [vmem:[%s1130_s7 + $0x28] sm:$0xff] (!%p781_p1)  ;;  %v550_v18 = vld [vmem:[%s1130_s7 + $0x30] sm:$0xff] (!%p781_p1) }
  0x54   : > { %v482_v34 = vrot.slane %v481_v26, 2  ;;  %v489_v35 = vrot.slane %v488_v27, 2  ;;  %v496_v36 = vrot.slane %v495_v28, 2  ;;  %v503_v37 = vrot.slane %v502_v29, 2  ;;  %v551_v19 = vld [vmem:[%s1130_s7 + $0x38] sm:$0xff] (!%p781_p1)  ;;  %v553_v25 = vld [vmem:[%s1130_s7 + $0x48] sm:$0xff] (!%p781_p1) }
  0x55   : > { %v462_v38 = vadd.f32 %v461_v30, %v460_v22  ;;  %v469_v39 = vadd.f32 %v468_v31, %v467_v23  ;;  %v476_v40 = vadd.f32 %v475_v32, %v474_v24  ;;  %v510_v41 = vrot.slane %v509_v33, 2  ;;  %v552_v24 = vld [vmem:[%s1130_s7 + $0x40] sm:$0xff] (!%p781_p1)  ;;  %v555_v31 = vld [vmem:[%s1130_s7 + $0x58] sm:$0xff] (!%p781_p1) }
  0x56   : > { %v483_v42 = vadd.f32 %v482_v34, %v481_v26  ;;  %v490_v43 = vadd.f32 %v489_v35, %v488_v27  ;;  %v497_v45 = vadd.f32 %v496_v36, %v495_v28  ;;  %v504_v46 = vadd.f32 %v503_v37, %v502_v29  ;;  %v554_v26 = vld [vmem:[%s1130_s7 + $0x50] sm:$0xff] (!%p781_p1)  ;;  %v556_v32 = vld [vmem:[%s1130_s7 + $0x60] sm:$0xff] (!%p781_p1) }
  0x57   : > { %v463_v47 = vrot.slane %v462_v38, 1  ;;  %v470_v48 = vrot.slane %v469_v39, 1  ;;  %v477_v49 = vrot.slane %v476_v40, 1  ;;  %v511_v50 = vadd.f32 %v510_v41, %v509_v33  ;;  %v557_v33 = vld [vmem:[%s1130_s7 + $0x68] sm:$0xff] (!%p781_p1) }
  0x58   : > { %v484_v52 = vrot.slane %v483_v42, 1  ;;  %v491_v53 = vrot.slane %v490_v43, 1  ;;  %v498_v54 = vrot.slane %v497_v45, 1  ;;  %v505_v55 = vrot.slane %v504_v46, 1 }
  0x59   : > { %v464_v56 = vadd.f32 %v463_v47, %v462_v38  ;;  %v471_v57 = vadd.f32 %v470_v48, %v469_v39  ;;  %v478_v58 = vadd.f32 %v477_v49, %v476_v40  ;;  %v512_v59 = vrot.slane %v511_v50, 1  ;;  %v558_v38 = vld [vmem:[%s1130_s7 + $0x70] sm:$0xff] (!%p781_p1)  ;;  %v559_v39 = vld [vmem:[%s1130_s7 + $0x78] sm:$0xff] (!%p781_p1) }
  0x5a   : > { %v485_v60 = vadd.f32 %v484_v52, %v483_v42  ;;  %v492_v61 = vadd.f32 %v491_v53, %v490_v43  ;;  %v499_v62 = vadd.f32 %v498_v54, %v497_v45  ;;  %v506_v0 = vadd.f32 %v505_v55, %v504_v46 }
  0x5b   : > { %v523_v63 = vsel %vm522_vm2, %v471_v57, %v464_v56  ;;  %v513_v2 = vadd.f32 %v512_v59, %v511_v50  ;;  %vm561_vm10 = vcmp.lt.s32.totalorder (!%p781_p1), %v1149_v51, 44  ;;  %v562_v15 = vsel (!%p781_p1), %vm560_vm9, %v544_v10, 0.0 }
  0x5c   : > { %v525_v1 = vsel %vm524_vm3, %v478_v58, %v523_v63  ;;  %v563_v16 = vsel (!%p781_p1), %vm561_vm10, %v545_v11, 0.0  ;;  %v564_v20 = vsel (!%p781_p1), %vm560_vm9, %v546_v12, 0.0  ;;  %v565_v21 = vsel (!%p781_p1), %vm561_vm10, %v547_v13, 0.0 }
  0x5d   : > { %v527_v3 = vsel %vm526_vm4, %v485_v60, %v525_v1  ;;  %v566_v22 = vsel (!%p781_p1), %vm560_vm9, %v548_v14, 0.0  ;;  %v578_v23 = vadd.f32 (!%p781_p1), %v563_v16, %v562_v15  ;;  %v567_v27 = vsel (!%p781_p1), %vm561_vm10, %v549_v17, 0.0 }
  0x5e   : > { %v529_v4 = vsel %vm528_vm5, %v492_v61, %v527_v3  ;;  %542 = sbr.rel (%p781_p1) target bundleno = 121 (0x79), region = 112  ;;  %v568_v28 = vsel (!%p781_p1), %vm560_vm9, %v550_v18, 0.0  ;;  %v569_v29 = vsel (!%p781_p1), %vm561_vm10, %v551_v19, 0.0  ;;  %v585_v30 = vadd.f32 (!%p781_p1), %v565_v21, %v564_v20 }
  0x5f   : > { %v531_v6 = vsel %vm530_vm6, %v499_v62, %v529_v4  ;;  %v570_v34 = vsel (!%p781_p1), %vm560_vm9, %v552_v24, 0.0  ;;  %v571_v35 = vsel (!%p781_p1), %vm561_vm10, %v553_v25, 0.0  ;;  %v572_v36 = vsel (!%p781_p1), %vm560_vm9, %v554_v26, 0.0 }
  0x60   : > { %v533_v7 = vsel %vm532_vm7, %v506_v0, %v531_v6  ;;  %v592_v37 = vadd.f32 (!%p781_p1), %v567_v27, %v566_v22  ;;  %v573_v40 = vsel (!%p781_p1), %vm561_vm10, %v555_v31, 0.0  ;;  %v574_v41 = vsel (!%p781_p1), %vm560_vm9, %v556_v32, 0.0 }
  0x61   : > { %v535_v8 = vsel %vm534_vm8, %v513_v2, %v533_v7  ;;  %v575_v42 = vsel (!%p781_p1), %vm561_vm10, %v557_v33, 0.0  ;;  %v579_v43 = vrot.slane (!%p781_p1), %v578_v23, 4  ;;  %v576_v45 = vsel (!%p781_p1), %vm560_vm9, %v558_v38, 0.0  ;;  %v543_v38 = vld [vmem:[#allocation6] sm:$0xff] (!%p781_p1) }
  0x62   : > { %v537_v9 = vadd.f32 %v535_v8, %v416_v5  ;;  %v577_v46 = vsel (!%p781_p1), %vm561_vm10, %v559_v39, 0.0  ;;  %v586_v47 = vrot.slane (!%p781_p1), %v585_v30, 4  ;;  %v593_v48 = vrot.slane (!%p781_p1), %v592_v37, 4 }
  0x63   : > { %v580_v49 = vadd.f32 (!%p781_p1), %v579_v43, %v578_v23  ;;  %v599_v50 = vadd.f32 (!%p781_p1), %v569_v29, %v568_v28  ;;  %v606_v52 = vadd.f32 (!%p781_p1), %v571_v35, %v570_v34  ;;  %v613_v53 = vadd.f32 (!%p781_p1), %v573_v40, %v572_v36 }
  0x64   : > { %538 = vst [vmem:[#allocation4] sm:$0xff] %v537_v9  ;;  %v587_v54 = vadd.f32 (!%p781_p1), %v586_v47, %v585_v30  ;;  %v594_v55 = vadd.f32 (!%p781_p1), %v593_v48, %v592_v37  ;;  %v620_v56 = vadd.f32 (!%p781_p1), %v575_v42, %v574_v41  ;;  %v627_v57 = vadd.f32 (!%p781_p1), %v577_v46, %v576_v45 }
  0x65   : > { %v581_v58 = vrot.slane %v580_v49, 2  ;;  %v600_v59 = vrot.slane %v599_v50, 4  ;;  %v607_v60 = vrot.slane %v606_v52, 4  ;;  %v614_v61 = vrot.slane %v613_v53, 4 }
  0x66   : > { %v588_v62 = vrot.slane %v587_v54, 2  ;;  %v595_v44 = vrot.slane %v594_v55, 2  ;;  %v621_v63 = vrot.slane %v620_v56, 4  ;;  %v628_v0 = vrot.slane %v627_v57, 4 }
  0x67   : > { %v582_v51 = vadd.f32 %v581_v58, %v580_v49  ;;  %v601_v1 = vadd.f32 %v600_v59, %v599_v50  ;;  %v608_v2 = vadd.f32 %v607_v60, %v606_v52  ;;  %v615_v3 = vadd.f32 %v614_v61, %v613_v53 }
  0x68   : > { %v589_v4 = vadd.f32 %v588_v62, %v587_v54  ;;  %v596_v5 = vadd.f32 %v595_v44, %v594_v55  ;;  %v622_v6 = vadd.f32 %v621_v63, %v620_v56  ;;  %v629_v7 = vadd.f32 %v628_v0, %v627_v57 }
  0x69   : > { %v583_v8 = vrot.slane %v582_v51, 1  ;;  %v602_v9 = vrot.slane %v601_v1, 2  ;;  %v609_v10 = vrot.slane %v608_v2, 2  ;;  %v616_v11 = vrot.slane %v615_v3, 2 }
  0x6a   : > { %v590_v12 = vrot.slane %v589_v4, 1  ;;  %v597_v13 = vrot.slane %v596_v5, 1  ;;  %v623_v14 = vrot.slane %v622_v6, 2  ;;  %v630_v15 = vrot.slane %v629_v7, 2 }
  0x6b   : > { %v584_v16 = vadd.f32 %v583_v8, %v582_v51  ;;  %v603_v17 = vadd.f32 %v602_v9, %v601_v1  ;;  %v610_v18 = vadd.f32 %v609_v10, %v608_v2  ;;  %v617_v19 = vadd.f32 %v616_v11, %v615_v3 }
  0x6c   : > { %v591_v20 = vadd.f32 %v590_v12, %v589_v4  ;;  %v598_v21 = vadd.f32 %v597_v13, %v596_v5  ;;  %v624_v22 = vadd.f32 %v623_v14, %v622_v6  ;;  %v631_v23 = vadd.f32 %v630_v15, %v629_v7 }
  0x6d   : > { %v604_v24 = vrot.slane %v603_v17, 1  ;;  %v611_v25 = vrot.slane %v610_v18, 1  ;;  %v618_v26 = vrot.slane %v617_v19, 1 }
  0x6e   : > { %v625_v27 = vrot.slane %v624_v22, 1  ;;  %v632_v28 = vrot.slane %v631_v23, 1  ;;  %v642_v29 = vsel %vm522_vm2, %v591_v20, %v584_v16 }
  0x6f   : > { %v605_v30 = vadd.f32 %v604_v24, %v603_v17  ;;  %v612_v31 = vadd.f32 %v611_v25, %v610_v18  ;;  %v619_v32 = vadd.f32 %v618_v26, %v617_v19  ;;  %v643_v33 = vsel %vm524_vm3, %v598_v21, %v642_v29 }
  0x70   : > { %v626_v34 = vadd.f32 %v625_v27, %v624_v22  ;;  %v633_v35 = vadd.f32 %v632_v28, %v631_v23 }
  0x71   : > { %v644_v36 = vsel %vm526_vm4, %v605_v30, %v643_v33 }
  0x72   : > { %v645_v37 = vsel %vm528_vm5, %v612_v31, %v644_v36 }
  0x73   : > { %v646_v39 = vsel %vm530_vm6, %v619_v32, %v645_v37 }
  0x74   : > { %v647_v40 = vsel %vm532_vm7, %v626_v34, %v646_v39 }
  0x75   : > { %v648_v41 = vsel %vm534_vm8, %v633_v35, %v647_v40 }
  0x76   : > { %v650_v42 = vadd.f32 %v648_v41, %v543_v38 }
  0x78   : > { %651 = vst [vmem:[#allocation6] sm:$0xff] %v650_v42 }
  0x79 PF: > { %p1239_p2 = scmp.eq.s32.totalorder %s767_s19, 3  ;;  %s978_s16 = smov [#allocation4]  }
  0x7a   : > { %s661_s8 = sshll.u32 %s978_s16, 4  ;;  %s979_s9 = smov [#allocation6]   ;;  %s662_s8 = int_to_ptr.vmem [resolvable:$true] %s661_s8 }
  0x7b   : > { %s674_s10 = sshll.u32 %s979_s9, 4  ;;  %s861_s11 = scalar_lea.vmem %s662_s8, 128  ;;  %s1243_s10 = int_to_ptr.vmem [resolvable:$true] %s674_s10 }
  0x7c   : > { %p862_p3 = scmp.ne.s32.totalorder %s662_s8, %s861_s11  ;;  %p868_p6 = scmp.lt.s32.totalorder %s662_s8, %s662_s8 }
  0x7d   : > { %p869_p7 = scmp.lt.s32.totalorder %s861_s11, %s861_s11 }
  0x7e   : > { %p863_p4 = pnand %p862_p3, %p1239_p2 }
  0x7f   : > { %p870_p8 = por %p869_p7, %p868_p6 }
  0x80   : > { %p864_p5 = pneg %p863_p4 }
  0x82   : > { %p871_p9 = pnand %p870_p8, %p864_p5 }
  0x84   : > { %874 = shalt.err (!%p871_p9)
}
  0x85   : > { %s875_s22 = scalar_lea.hbm %s1317_s2, 128 }
  0x86   : > { %p876_p10 = scmp.ne.s32.totalorder %s1317_s2, %s875_s22  ;;  %p881_p13 = scmp.lt.u32.totalorder %s875_s22, %s1317_s2 }
  0x88   : > { %p877_p11 = pnand %p876_p10, %p1239_p2 }
  0x8a   : > { %p878_p12 = pneg %p877_p11 }
  0x8c   : > { %p883_p0 = pnand %p881_p13, %p878_p12 }
  0x8e   : > { %886 = shalt.err (!%p883_p0)
}
  0x8f   : > { %791 = dma.vmem_to_hbm [thread:$0]  (%p1239_p2), %s662_s8, 128, %s1317_s2, [#allocation5]  }
  0x90   : > { %s887_s4 = scalar_lea.vmem %s1243_s10, 128  ;;  %p894_p5 = scmp.lt.s32.totalorder %s1243_s10, %s1243_s10 }
  0x91   : > { %p888_p1 = scmp.ne.s32.totalorder %s1243_s10, %s887_s4  ;;  %p895_p6 = scmp.lt.s32.totalorder %s887_s4, %s887_s4 }
  0x93   : > { %p889_p3 = pnand %p888_p1, %p1239_p2  ;;  %p896_p7 = por %p895_p6, %p894_p5 }
  0x95   : > { %p890_p4 = pneg %p889_p3 }
  0x97   : > { %p897_p8 = pnand %p896_p7, %p890_p4 }
  0x99   : > { %900 = shalt.err (!%p897_p8)
}
  0x9a   : > { %s901_s7 = scalar_lea.hbm %s1318_s3, 128 }
  0x9b   : > { %p902_p9 = scmp.ne.s32.totalorder %s1318_s3, %s901_s7  ;;  %p907_p12 = scmp.lt.u32.totalorder %s901_s7, %s1318_s3 }
  0x9d   : > { %p903_p10 = pnand %p902_p9, %p1239_p2 }
  0x9f   : > { %p904_p11 = pneg %p903_p10 }
  0xa1   : > { %p909_p13 = pnand %p907_p12, %p904_p11 }
  0xa3   : > { %912 = shalt.err (!%p909_p13)
}
  0xa4   : > { %793 = dma.vmem_to_hbm [thread:$0]  (%p1239_p2), %s1243_s10, 128, %s1318_s3, [#allocation7]  }
  0xa5   : > { %942 = dma.done.wait (%p1239_p2), [#allocation5], 128  }
  0xa6   : > { %944 = vsyncadd (%p1239_p2), [#allocation5], 4294967168 }
  0xa7   : > { %946 = dma.done.wait (%p1239_p2), [#allocation7], 128  }
  0xa8   : > { %948 = vsyncadd (%p1239_p2), [#allocation7], 4294967168 }
  0xa9 PF: > { %s16_s18 = sadd.s32 1, %s975_s18   ;;  %s1322_s12 = smov %s955_s13 }
  0xaa   : > { %p13_p0 = scmp.ge.s32.totalorder %s16_s18, 6   ;;  %s1323_s13 = smov %s1071_s30 }
  0xab   : > { %s1324_s14 = smov %s963_s15  ;;  %s1325_s15 = smov %s1057_s25 }
  0xac   : > { %s1326_s16 = smov %s971_s17  ;;  %s1327_s17 = smov %s1329_s20 }
  0xad   :  { %15 = sbr.rel (!%p13_p0) target bundleno = 5 (0x5), region = 162 }
  0xb4   :  { %691 = vsyncpa [#allocation5], 1 }
  0xb5   :  { %693 = vsyncpa [#allocation5 + $0x1], 1 }
  0xb6   :  { %694 = vsyncpa [#allocation7], 1 }

</bundles_post_ra>
